<compile_context>
chip_gen: v7x
topology: tpu7x:2x2x1
jax: 0.10.0
libtpu: 0.0.40
codegen_flags: <defaults>
</compile_context>

<pallas_src>
import functools

import jax
import jax.numpy as jnp
from jax.experimental import pallas as pl
from jax.experimental.pallas import tpu as pltpu
import numpy as np


def _blur_kernel(x_ref, o_ref, pad_ref, *, scale):
    # x_ref:  (1, TC, H, W) input block (input dtype)
    # o_ref:  (1, TC, H, W) output block (input dtype)
    # pad_ref: (TC, H+2, W+2) f32 VMEM scratch (zero-bordered halo plane)
    tc, hp2, wp2 = pad_ref.shape
    H, W = hp2 - 2, wp2 - 2

    # In-kernel halo handling: zero the scratch (cheap VMEM-only traffic),
    # then copy the interior once, casting to f32 a single time.
    pad_ref[...] = jnp.zeros_like(pad_ref)
    pad_ref[:, 1:H + 1, 1:W + 1] = x_ref[0].astype(jnp.float32)

    # Separable blur: vertical [1,2,1] pass over the full padded width...
    top = pad_ref[:, 0:H, :]
    mid = pad_ref[:, 1:H + 1, :]
    bot = pad_ref[:, 2:H + 2, :]
    v = top + mid + mid + bot                      # (TC, H, W+2); edge cols stay 0

    # ...then horizontal [1,2,1] pass, and one final normalization scale.
    lf = v[:, :, 0:W]
    cc = v[:, :, 1:W + 1]
    rt = v[:, :, 2:W + 2]
    res = lf + cc + cc + rt                        # (TC, H, W)
    if scale != 1.0:
        res = res * scale

    o_ref[0] = res.astype(o_ref.dtype)


def _pick_channel_tile(C, H, W):
    """Largest divisor of C whose f32 working tile stays <= ~1 MiB.

    Keeps double-buffered in/out blocks + the halo scratch comfortably inside
    the default scoped VMEM on all generations (16 MiB v5e / 32 MiB v6e, v7x).
    """
    budget_bytes = 1 << 20
    per_channel = H * W * 4
    max_tc = max(1, budget_bytes // per_channel)
    tc = 1
    for d in range(1, C + 1):
        if C % d == 0 and d <= max_tc:
            tc = d
    return tc


def blur_layer(x, normalize=True, flip=False, stride=1):
    """x: (N, C, H, W) array. Returns (N, C, H, W), matching BlurLayer.forward."""
    assert stride == 1  # TODO(synk): general stride not implemented (module default is 1)
    del flip  # [1,2,1] x [1,2,1] is symmetric; flipping is a no-op.
    N, C, H, W = x.shape
    scale = 1.0 / 16.0 if normalize else 1.0

    tc = _pick_channel_tile(C, H, W)
    grid = (N, C // tc)

    kernel = functools.partial(_blur_kernel, scale=scale)

    return pl.pallas_call(
        kernel,
        out_shape=jax.ShapeDtypeStruct((N, C, H, W), x.dtype),
        grid_spec=pltpu.PrefetchScalarGridSpec(
            num_scalar_prefetch=0,
            grid=grid,
            in_specs=[pl.BlockSpec((1, tc, H, W), lambda n, c: (n, c, 0, 0))],
            out_specs=pl.BlockSpec((1, tc, H, W), lambda n, c: (n, c, 0, 0)),
            scratch_shapes=[pltpu.VMEM((tc, H + 2, W + 2), jnp.float32)],
        ),
        compiler_params=pltpu.CompilerParams(
            dimension_semantics=("parallel", "parallel")),
    )(x)


def _reference_blur(x, normalize=True, flip=False):
    # Pure-JAX reference (explicit 9-tap conv) for verification.
    k = np.array([1.0, 2.0, 1.0], dtype=np.float32)
    k2 = k[:, None] * k[None, :]
    if normalize:
        k2 = k2 / k2.sum()
    if flip:
        k2 = k2[::-1, ::-1]
    N, C, H, W = x.shape
    xp = jnp.pad(x.astype(jnp.float32), ((0, 0), (0, 0), (1, 1), (1, 1)))
    out = jnp.zeros((N, C, H, W), jnp.float32)
    for di in range(3):
        for dj in range(3):
            out = out + float(k2[di, dj]) * xp[:, :, di:di + H, dj:dj + W]
    return out.astype(x.dtype)


if __name__ == "__main__":
    key = jax.random.PRNGKey(0)
    x = jax.random.normal(key, (2, 4, 16, 16), dtype=jnp.float32)

    y = jax.block_until_ready(blur_layer(x))
    y_ref = _reference_blur(x)

    assert y.shape == x.shape
    assert jnp.allclose(y, y_ref, atol=1e-5, rtol=1e-5)

    print("KERNEL_OK")
</pallas_src>

<mosaic_0001>
module attributes {stable_mosaic.version = 11 : i64} {
  func.func @_blur_kernel(%arg0: i32, %arg1: i32, %arg2: memref<1x4x16x16xf32, #tpu.memory_space<vmem>>, %arg3: memref<1x4x16x16xf32, #tpu.memory_space<vmem>>, %arg4: memref<4x18x18xf32, #tpu.memory_space<vmem>>) attributes {dimension_semantics = [#tpu.dimension_semantics<parallel>, #tpu.dimension_semantics<parallel>], iteration_bounds = array<i64: 2, 1>, scalar_prefetch = 0 : i64, scratch_operands = 1 : i64, tpu.core_type = #tpu.core_type<tc>, window_params = [{transform_indices = @transform_0, window_bounds = array<i64: 1, 4, 16, 16>}, {transform_indices = @transform_1, window_bounds = array<i64: 1, 4, 16, 16>}]} {
    %cst = arith.constant 0.000000e+00 : f32
    %0 = vector.broadcast %cst : f32 to vector<4x18x18xf32>
    %c0 = arith.constant 0 : index
    %c0_0 = arith.constant 0 : index
    %c0_1 = arith.constant 0 : index
    %1 = vector.load %arg4[%c0, %c0_0, %c0_1] : memref<4x18x18xf32, #tpu.memory_space<vmem>>, vector<4x18x18xf32>
    tpu.vector_store %arg4[%c0, %c0_0, %c0_1], %0 {strides = array<i32>} : memref<4x18x18xf32, #tpu.memory_space<vmem>>, vector<4x18x18xf32>,
    %c0_2 = arith.constant 0 : index
    %c0_3 = arith.constant 0 : index
    %c0_4 = arith.constant 0 : index
    %c0_5 = arith.constant 0 : index
    %2 = vector.load %arg2[%c0_2, %c0_3, %c0_4, %c0_5] : memref<1x4x16x16xf32, #tpu.memory_space<vmem>>, vector<1x4x16x16xf32>
    %3 = vector.shape_cast %2 : vector<1x4x16x16xf32> to vector<4x16x16xf32>
    %c0_6 = arith.constant 0 : index
    %c1 = arith.constant 1 : index
    %c1_7 = arith.constant 1 : index
    %4 = vector.load %arg4[%c0_6, %c1, %c1_7] : memref<4x18x18xf32, #tpu.memory_space<vmem>>, vector<4x16x16xf32>
    tpu.vector_store %arg4[%c0_6, %c1, %c1_7], %3 {strides = array<i32>} : memref<4x18x18xf32, #tpu.memory_space<vmem>>, vector<4x16x16xf32>,
    %c0_8 = arith.constant 0 : index
    %c0_9 = arith.constant 0 : index
    %c0_10 = arith.constant 0 : index
    %5 = vector.load %arg4[%c0_8, %c0_9, %c0_10] : memref<4x18x18xf32, #tpu.memory_space<vmem>>, vector<4x16x18xf32>
    %c0_11 = arith.constant 0 : index
    %c1_12 = arith.constant 1 : index
    %c0_13 = arith.constant 0 : index
    %6 = vector.load %arg4[%c0_11, %c1_12, %c0_13] : memref<4x18x18xf32, #tpu.memory_space<vmem>>, vector<4x16x18xf32>
    %c0_14 = arith.constant 0 : index
    %c2 = arith.constant 2 : index
    %c0_15 = arith.constant 0 : index
    %7 = vector.load %arg4[%c0_14, %c2, %c0_15] : memref<4x18x18xf32, #tpu.memory_space<vmem>>, vector<4x16x18xf32>
    %8 = arith.addf %5, %6 : vector<4x16x18xf32>
    %9 = arith.addf %8, %6 : vector<4x16x18xf32>
    %10 = arith.addf %9, %7 : vector<4x16x18xf32>
    %11 = vector.extract_strided_slice %10 {offsets = [0, 0, 0], sizes = [4, 16, 16], strides = [1, 1, 1]} : vector<4x16x18xf32> to vector<4x16x16xf32>
    %12 = vector.extract_strided_slice %10 {offsets = [0, 0, 1], sizes = [4, 16, 16], strides = [1, 1, 1]} : vector<4x16x18xf32> to vector<4x16x16xf32>
    %13 = vector.extract_strided_slice %10 {offsets = [0, 0, 2], sizes = [4, 16, 16], strides = [1, 1, 1]} : vector<4x16x18xf32> to vector<4x16x16xf32>
    %14 = arith.addf %11, %12 : vector<4x16x16xf32>
    %15 = arith.addf %14, %12 : vector<4x16x16xf32>
    %16 = arith.addf %15, %13 : vector<4x16x16xf32>
    %cst_16 = arith.constant 6.250000e-02 : f32
    %17 = vector.broadcast %cst_16 : f32 to vector<4x16x16xf32>
    %18 = arith.mulf %16, %17 : vector<4x16x16xf32>
    %c0_17 = arith.constant 0 : index
    %c0_18 = arith.constant 0 : index
    %c0_19 = arith.constant 0 : index
    %c0_20 = arith.constant 0 : index
    %19 = vector.load %arg3[%c0_17, %c0_18, %c0_19, %c0_20] : memref<1x4x16x16xf32, #tpu.memory_space<vmem>>, vector<1x4x16x16xf32>
    %20 = vector.shape_cast %19 : vector<1x4x16x16xf32> to vector<4x16x16xf32>
    %21 = vector.shape_cast %18 : vector<4x16x16xf32> to vector<1x4x16x16xf32>
    tpu.vector_store %arg3[%c0_17, %c0_18, %c0_19, %c0_20], %21 {strides = array<i32>} : memref<1x4x16x16xf32, #tpu.memory_space<vmem>>, vector<1x4x16x16xf32>,
    return
  }
  func.func @transform_0(%arg0: i32, %arg1: i32) -> (i32, i32, i32, i32) {
    %c0_i32 = arith.constant 0 : i32
    %c0_i32_0 = arith.constant 0 : i32
    %c0_i32_1 = arith.constant 0 : i32
    return %arg0, %arg1, %c0_i32, %c0_i32_0 : i32, i32, i32, i32
  }
  func.func @transform_1(%arg0: i32, %arg1: i32) -> (i32, i32, i32, i32) {
    %c0_i32 = arith.constant 0 : i32
    %c0_i32_0 = arith.constant 0 : i32
    %c0_i32_1 = arith.constant 0 : i32
    return %arg0, %arg1, %c0_i32, %c0_i32_0 : i32, i32, i32, i32
  }
}

</mosaic_0001>

<bundles_post_ra>
// kernel: tpu_custom_call.1
= control target key start
LH: loop header
LB: loop body
LE: loop exit
PB: predicated region body
PF: predicated region fallthrough
CT: control target
= control target key end

     0   :  { %6 = vsyncpa [#allocation4], 0  ;;  %s913_s0 = inlined_call_operand.hbm [shape: f32[2,4,16,16], index: 0, kind: input, shape index: {}]   ;;  %s914_s1 = inlined_call_operand.hbm [shape: f32[2,4,16,16], index: 1, kind: output, shape index: {}]  }
   0x1   :  { %8 = vsyncpa [#allocation4 + $0x1], 0 }
   0x2   :  { %9 = vsyncpa [#allocation5], 0 }
   0x3   :  { %11 = vsyncpa [#allocation5 + $0x1], 0  ;;  %s689_s6 = smov 0   ;;  %s691_s7 = smov 0  }
   0x4   :  { %s693_s8 = smov 0   ;;  %s695_s9 = smov 0  }
   0x5   :  { %s697_s10 = smov 0   ;;  %s699_s11 = smov 0  }
   0x6 LB: > { %s468_s12 = sadd.s32 4294967295, %s667_s11   ;;  %s469_s13 = sadd.s32 4294967294, %s667_s11   ;;  %s667_s11 = sphi %s699_s11, %s17_s11   ;;  %s663_s10 = sphi %s697_s10, %s929_s10   ;;  %s659_s9 = sphi %s695_s9, %s928_s9   ;;  %s655_s8 = sphi %s693_s8, %s927_s8   ;;  %s651_s7 = sphi %s691_s7, %s926_s7   ;;  %s647_s6 = sphi %s689_s6, %s925_s6  }
   0x7   : > { %s29_s14 = sadd.s32 1, %s663_s10  ;;  %s38_s15 = sadd.s32 1, %s655_s8 }
   0x8   : > { %p31_p0 = scmp.ge.s32.totalorder %s29_s14, 2  ;;  %p45_p1 = scmp.ne.s32.totalorder %s655_s8, %s651_s7 }
   0x9   : > { %p46_p2 = scmp.eq.s32.totalorder %s667_s11, 0  ;;  %p51_p3 = scmp.ne.s32.totalorder %s651_s7, %s647_s6 }
   0xa   : > { %s931_s14 = smov (%p31_p0, %s29_s14), 0  ;;  %p52_p5 = scmp.eq.s32.totalorder %s468_s12, 0 }
   0xb   : > { %p730_p4 = por %p46_p2, %p45_p1  ;;  %s33_s17 = ssub.s32 %s663_s10, %s931_s14 }
   0xc   : > { %p77_p6 = scmp.eq.s32.totalorder %s468_s12, 1  ;;  %p36_p7 = scmp.eq.s32.totalorder %s33_s17, 0 }
   0xd   : > { %p736_p8 = por %p52_p5, %p51_p3  ;;  %p83_p10 = scmp.eq.s32.totalorder %s469_s13, 1 }
   0xe   : > { %p740_p9 = por %p77_p6, %p45_p1  ;;  %p497_p13 = scmp.lt.s32.totalorder %s667_s11, 2 }
   0xf   : > { %s745_s20 = scalar_select %p36_p7, %s655_s8, %s38_s15  }
  0x10   : > { %s918_s19 = scalar_select %p740_p9, 1, 0 }
  0x11   : > { %p747_p11 = por %p83_p10, %p51_p3  ;;  %s103_s22 = sand.u32 1, %s655_s8  }
  0x12   : > { %s472_s23 = sshll.u32 %s103_s22, 6  ;;  %s483_s24 = sshll.u32 %s663_s10, 10 }
  0x13   : > { %s919_s21 = scalar_select %p747_p11, 1, 0 }
  0x14   : > { %s758_s27 = scalar_lea.hbm %s913_s0, %s483_s24  ;;  %s107_s28 = scalar_lea.vmem [#allocation3], %s472_s23 }
  0x15   : > { %s117_s29 = sshll.u32 %s107_s28, 4  ;;  %p764_p0 = pnand %p497_p13, %p730_p4  ;;  %s760_s29 = int_to_ptr.vmem [resolvable:$true] %s117_s29 }
  0x16   : > { %s769_s2 = scalar_lea.sflag [#allocation4], %s103_s22  ;;  %s555_s3 = scalar_lea.hbm %s758_s27, 1024 }
  0x17   : > { %p556_p2 = scmp.ne.s32.totalorder %s758_s27, %s555_s3  ;;  %p557_p3 = pneg %p764_p0 }
  0x18   : > { %s560_s12 = scalar_lea.hbm %s913_s0, 2048  ;;  %p561_p4 = scmp.lt.u32.totalorder %s758_s27, %s913_s0 }
  0x19   : > { %p558_p5 = pnand %p557_p3, %p556_p2  ;;  %p562_p7 = scmp.lt.u32.totalorder %s560_s12, %s555_s3 }
  0x1a   : > { %p564_p13 = scmp.lt.u32.totalorder %s555_s3, %s758_s27 }
  0x1b   : > { %p559_p6 = pneg %p558_p5  ;;  %p563_p10 = por %p562_p7, %p561_p4 }
  0x1d   : > { %p565_p12 = por %p564_p13, %p563_p10 }
  0x1f   : > { %p566_p1 = pnand %p565_p12, %p559_p6 }
  0x21   : > { %569 = shalt.err (!%p566_p1)
}
  0x22   : > { %s570_s16 = scalar_lea.vmem %s760_s29, 1024  ;;  %s669_s17 = smov [#allocation3]  }
  0x23   : > { %p571_p2 = scmp.ne.s32.totalorder %s760_s29, %s570_s16  ;;  %s575_s22 = sshll.u32 %s669_s17, 4  ;;  %s576_s22 = int_to_ptr.vmem [resolvable:$false] %s575_s22 }
  0x24   : > { %s577_s23 = scalar_lea.vmem %s576_s22, 2048  ;;  %p578_p9 = scmp.lt.s32.totalorder %s760_s29, %s576_s22 }
  0x25   : > { %p573_p5 = pnand %p571_p2, %p557_p3  ;;  %p579_p4 = scmp.lt.s32.totalorder %s577_s23, %s570_s16 }
  0x27   : > { %p574_p11 = pneg %p573_p5  ;;  %p580_p7 = por %p579_p4, %p578_p9 }
  0x29   : > { %p581_p10 = pnand %p580_p7, %p574_p11 }
  0x2b   : > { %584 = shalt.err (!%p581_p10)
}
  0x2c   : > { %s670_s24 = smov 128   ;;  %s671_s25 = smov 8  }
  0x2d   : > { %492 = dma.hbm_to_vmem [thread:$0]  (!%p764_p0), %s758_s27, 1024, %s760_s29, %s769_s2, %s670_s24, %s670_s24, %s671_s25  }
  0x2e   : > { %p125_p12 = scmp.lt.s32.totalorder %s667_s11, 3  ;;  %p921_p1 = scmp.ge.s32.totalorder %s667_s11, 1 }
  0x30   : > { %p126_p3 = pnand %p921_p1, %p125_p12 }
  0x31   : > { %s801_s26 = sand.u32 (!%p126_p3), 1, %s651_s7  }
  0x32   : > { %129 = sbr.rel (%p126_p3) target bundleno = 357 (0x165), region = 24  ;;  %s476_s28 = sshll.u32 (!%p126_p3), %s801_s26, 6 }
  0x33   : > { %s132_s3 = scalar_lea.sflag (!%p126_p3), [#allocation4], %s801_s26  ;;  %s807_s4 = scalar_lea.vmem (!%p126_p3), [#allocation3], %s476_s28 }
  0x39   : > { %638 = dma.done.wait (%p736_p8), %s132_s3, 1024  }
  0x3a   : > { %640 = vsyncadd (%p736_p8), %s132_s3, 4294966272  ;;  %vm156_vm0 = vcmask 146432   ;;  %vm159_vm1 = vcmask 140288   ;;  %v672_v0 = vmov 0.0   ;;  %v172_v1 = vld [vmem:[%s807_s4 + $0x10] sm:$0xff]  ;;  %v170_v2 = vld [vmem:[%s807_s4] sm:$0xff] }
  0x3b   : > { %161 = vst.msk [vmem:[#allocation2 + $0x18] sm:$0xff] %vm156_vm0, %v672_v0  ;;  %162 = vst.msk [vmem:[#allocation2 + $0x20] sm:$0xff] %vm156_vm0, %v672_v0  ;;  %s673_s18 = smov 1   ;;  %v173_v3 = vld [vmem:[%s807_s4 + $0x18] sm:$0xff]  ;;  %v171_v4 = vld [vmem:[%s807_s4 + $0x8] sm:$0xff]  ;;  %vm210_vm2 = vcmask 138248  }
  0x3c   : > { %157 = vst.msk [vmem:[#allocation2] sm:$0xff] %vm156_vm0, %v672_v0  ;;  %158 = vst.msk [vmem:[#allocation2 + $0x8] sm:$0xff] %vm156_vm0, %v672_v0  ;;  %190 = vrot.lane.b32.xlu1 %v172_v1, %s673_s18  ;;  %186 = vrot.lane.b32.xlu0 %v170_v2, %s673_s18  ;;  %v175_v5 = vld [vmem:[%s807_s4 + $0x28] sm:$0xff]  ;;  %v174_v6 = vld [vmem:[%s807_s4 + $0x20] sm:$0xff]  ;;  %s674_s27 = smov 127   ;;  %s675_s29 = smov 126  }
  0x3d   : > { %164 = vst.msk [vmem:[#allocation2 + $0x30] sm:$0xff] %vm156_vm0, %v672_v0  ;;  %165 = vst.msk [vmem:[#allocation2 + $0x38] sm:$0xff] %vm156_vm0, %v672_v0  ;;  %v177_v7 = vld [vmem:[%s807_s4 + $0x38] sm:$0xff]  ;;  %v176_v8 = vld [vmem:[%s807_s4 + $0x30] sm:$0xff]  ;;  %vm355_vm3 = vcmask 130048   ;;  %s839_s30 = scalar_lea.vmem [#allocation6], %s476_s28 }
  0x3e   : > { %167 = vst.msk [vmem:[#allocation2 + $0x48] sm:$0xff] %vm156_vm0, %v672_v0  ;;  %168 = vst.msk [vmem:[#allocation2 + $0x50] sm:$0xff] %vm156_vm0, %v672_v0  ;;  %s484_s2 = sshll.u32 %s659_s9, 10  ;;  %s381_s5 = sshll.u32 %s839_s30, 4  ;;  %s862_s5 = int_to_ptr.vmem [resolvable:$true] %s381_s5 }
  0x3f   : > { %163 = vst.msk [vmem:[#allocation2 + $0x28] sm:$0x3] %vm159_vm1, %v672_v0  ;;  %160 = vst.msk [vmem:[#allocation2 + $0x10] sm:$0x3] %vm159_vm1, %v672_v0  ;;  %s860_s15 = scalar_lea.hbm %s914_s1, %s484_s2  ;;  %s365_s9 = scalar_lea.sflag [#allocation5], %s801_s26 }
  0x40   : > { %166 = vst.msk [vmem:[#allocation2 + $0x40] sm:$0x3] %vm159_vm1, %v672_v0  ;;  %169 = vst.msk [vmem:[#allocation2 + $0x58] sm:$0x3] %vm159_vm1, %v672_v0  ;;  %192 = vrot.lane.b32.xlu1 %v173_v3, %s673_s18  ;;  %188 = vrot.lane.b32.xlu0 %v171_v4, %s673_s18  ;;  %s585_s16 = scalar_lea.vmem %s862_s5, 1024  ;;  %p922_p9 = scmp.ne.s32.totalorder %s918_s19, 0 }
  0x41   : > { %p586_p8 = scmp.ne.s32.totalorder %s862_s5, %s585_s16  ;;  %s676_s17 = smov [#allocation6]  }
  0x42   : > { %s589_s22 = sshll.u32 %s676_s17, 4  ;;  %s590_s22 = int_to_ptr.vmem [resolvable:$false] %s589_s22 }
  0x43   : > { %p587_p11 = pnand %p586_p8, %p922_p9  ;;  %s591_s23 = scalar_lea.vmem %s590_s22, 2048 }
  0x44   : > { %196 = vrot.lane.b32.xlu1 %v175_v5, %s673_s18  ;;  %194 = vrot.lane.b32.xlu0 %v174_v6, %s673_s18  ;;  %p592_p6 = scmp.lt.s32.totalorder %s862_s5, %s590_s22  ;;  %p593_p13 = scmp.lt.s32.totalorder %s591_s23, %s585_s16 }
  0x45   : > { %p588_p0 = pneg %p587_p11 }
  0x46   : > { %p594_p2 = por %p593_p13, %p592_p6 }
  0x48   : > { %200 = vrot.lane.b32.xlu1 %v177_v7, %s673_s18  ;;  %198 = vrot.lane.b32.xlu0 %v176_v8, %s673_s18  ;;  %p595_p5 = pnand %p594_p2, %p588_p0 }
  0xae   : > { %v191_v9 = vpop.permute.xlu1 %190  ;;  %v187_v10 = vpop.permute.xlu0 %186 }
  0xaf   : > { %213 = vst.msk [vmem:[#allocation2 + $0x19] sm:$0xff] %vm210_vm2, %v191_v9  ;;  %211 = vst.msk [vmem:[#allocation2 + $0x1] sm:$0xff] %vm210_vm2, %v187_v10 }
  0xb2   : > { %v193_v11 = vpop.permute.xlu1 %192  ;;  %v189_v12 = vpop.permute.xlu0 %188 }
  0xb3   : > { %214 = vst.msk [vmem:[#allocation2 + $0x21] sm:$0xff] %vm210_vm2, %v193_v11  ;;  %212 = vst.msk [vmem:[#allocation2 + $0x9] sm:$0xff] %vm210_vm2, %v189_v12 }
  0xb6   : > { %v197_v13 = vpop.permute.xlu1 %196  ;;  %v195_v14 = vpop.permute.xlu0 %194  ;;  %v219_v15 = vld [vmem:[#allocation2] sm:$0xff]  ;;  %v221_v17 = vld [vmem:[#allocation2 + $0x18] sm:$0xff] }
  0xb7   : > { %v227_v16 = vld [vmem:[#allocation2 + $0x1] sm:$0xff]  ;;  %216 = vst.msk [vmem:[#allocation2 + $0x39] sm:$0xff] %vm210_vm2, %v197_v13  ;;  %215 = vst.msk [vmem:[#allocation2 + $0x31] sm:$0xff] %vm210_vm2, %v195_v14  ;;  %v229_v19 = vld [vmem:[#allocation2 + $0x19] sm:$0xff] }
  0xb8   : > { %v243_v18 = vadd.f32 %v227_v16, %v219_v15  ;;  %v245_v20 = vadd.f32 %v229_v19, %v221_v17 }
  0xba   : > { %v251_v21 = vadd.f32 %v243_v18, %v227_v16  ;;  %v201_v22 = vpop.permute.xlu1 %200  ;;  %v199_v23 = vpop.permute.xlu0 %198  ;;  %v235_v24 = vld [vmem:[#allocation2 + $0x2] sm:$0xff]  ;;  %v253_v29 = vadd.f32 %v245_v20, %v229_v19  ;;  %v237_v31 = vld [vmem:[#allocation2 + $0x1a] sm:$0xff]  ;;  %v236_v35 = vld [vmem:[#allocation2 + $0xa] sm:$0xff] }
  0xbb   : > { %v220_v25 = vld [vmem:[#allocation2 + $0x8] sm:$0xff]  ;;  %218 = vst.msk [vmem:[#allocation2 + $0x51] sm:$0xff] %vm210_vm2, %v201_v22  ;;  %217 = vst.msk [vmem:[#allocation2 + $0x49] sm:$0xff] %vm210_vm2, %v199_v23  ;;  %v222_v30 = vld [vmem:[#allocation2 + $0x20] sm:$0xff] }
  0xbc   : > { %v228_v26 = vld [vmem:[#allocation2 + $0x9] sm:$0xff]  ;;  %v259_v27 = vadd.f32 %v251_v21, %v235_v24  ;;  %v230_v32 = vld [vmem:[#allocation2 + $0x21] sm:$0xff]  ;;  %v261_v39 = vadd.f32 %v253_v29, %v237_v31 }
  0xbd   : > { %v244_v28 = vadd.f32 %v228_v26, %v220_v25  ;;  %v246_v34 = vadd.f32 %v230_v32, %v222_v30  ;;  %v238_v44 = vld [vmem:[#allocation2 + $0x22] sm:$0xff] }
  0xbe   : > { %275 = vrot.lane.b32.xlu0 %v259_v27, %s674_s27  ;;  %v223_v36 = vld [vmem:[#allocation2 + $0x30] sm:$0xff]  ;;  %v224_v42 = vld [vmem:[#allocation2 + $0x38] sm:$0xff] }
  0xbf   : > { %v252_v33 = vadd.f32 %v244_v28, %v228_v26  ;;  %v231_v37 = vld [vmem:[#allocation2 + $0x31] sm:$0xff]  ;;  %v254_v40 = vadd.f32 %v246_v34, %v230_v32  ;;  %v232_v43 = vld [vmem:[#allocation2 + $0x39] sm:$0xff] }
  0xc0   : > { %v247_v41 = vadd.f32 %v231_v37, %v223_v36  ;;  %v239_v45 = vld [vmem:[#allocation2 + $0x32] sm:$0xff]  ;;  %v248_v46 = vadd.f32 %v232_v43, %v224_v42  ;;  %v240_v56 = vld [vmem:[#allocation2 + $0x3a] sm:$0xff] }
  0xc1   : > { %v260_v38 = vadd.f32 %v252_v33, %v236_v35  ;;  %v262_v50 = vadd.f32 %v254_v40, %v238_v44 }
  0xc2   : > { %279 = vrot.lane.b32.xlu0 %v261_v39, %s674_s27  ;;  %v255_v47 = vadd.f32 %v247_v41, %v231_v37  ;;  %v225_v48 = vld [vmem:[#allocation2 + $0x48] sm:$0xff]  ;;  %v256_v52 = vadd.f32 %v248_v46, %v232_v43  ;;  %v226_v54 = vld [vmem:[#allocation2 + $0x50] sm:$0xff] }
  0xc3   : > { %277 = vrot.lane.b32.xlu1 %v260_v38, %s674_s27  ;;  %v233_v49 = vld [vmem:[#allocation2 + $0x49] sm:$0xff]  ;;  %v234_v55 = vld [vmem:[#allocation2 + $0x51] sm:$0xff] }
  0xc4   : > { %v263_v51 = vadd.f32 %v255_v47, %v239_v45  ;;  %v249_v53 = vadd.f32 %v233_v49, %v225_v48  ;;  %v241_v57 = vld [vmem:[#allocation2 + $0x4a] sm:$0xff]  ;;  %v250_v58 = vadd.f32 %v234_v55, %v226_v54  ;;  %v264_v60 = vadd.f32 %v256_v52, %v240_v56  ;;  %v242_v63 = vld [vmem:[#allocation2 + $0x52] sm:$0xff] }
  0xc6   : > { %283 = vrot.lane.b32.xlu0 %v263_v51, %s674_s27  ;;  %v257_v59 = vadd.f32 %v249_v53, %v233_v49  ;;  %v258_v62 = vadd.f32 %v250_v58, %v234_v55 }
  0xc7   : > { %281 = vrot.lane.b32.xlu1 %v262_v50, %s674_s27 }
  0xc8   : > { %v265_v61 = vadd.f32 %v257_v59, %v241_v57  ;;  %v266_v0 = vadd.f32 %v258_v62, %v242_v63 }
  0xca   : > { %287 = vrot.lane.b32.xlu0 %v265_v61, %s674_s27 }
  0xcb   : > { %285 = vrot.lane.b32.xlu1 %v264_v60, %s674_s27 }
  0xce   : > { %315 = vrot.lane.b32.xlu0 %v259_v27, %s675_s29 }
  0xcf   : > { %289 = vrot.lane.b32.xlu1 %v266_v0, %s674_s27 }
  0xd2   : > { %319 = vrot.lane.b32.xlu0 %v261_v39, %s675_s29 }
  0xd3   : > { %317 = vrot.lane.b32.xlu1 %v260_v38, %s675_s29 }
  0xd6   : > { %323 = vrot.lane.b32.xlu0 %v263_v51, %s675_s29 }
  0xd7   : > { %321 = vrot.lane.b32.xlu1 %v262_v50, %s675_s29 }
  0xda   : > { %327 = vrot.lane.b32.xlu0 %v265_v61, %s675_s29 }
  0xdb   : > { %325 = vrot.lane.b32.xlu1 %v264_v60, %s675_s29 }
  0xdf   : > { %329 = vrot.lane.b32.xlu1 %v266_v0, %s675_s29 }
 0x130   : > { %v276_v1 = vpop.permute.xlu0 %275 }
 0x131   : > { %v299_v6 = vadd.f32 %v276_v1, %v259_v27 }
 0x133   : > { %v307_v9 = vadd.f32 %v299_v6, %v276_v1 }
 0x134   : > { %v280_v3 = vpop.permute.xlu0 %279 }
 0x135   : > { %v278_v2 = vpop.permute.xlu1 %277  ;;  %v301_v11 = vadd.f32 %v280_v3, %v261_v39 }
 0x136   : > { %v300_v10 = vadd.f32 %v278_v2, %v260_v38 }
 0x137   : > { %v309_v17 = vadd.f32 %v301_v11, %v280_v3 }
 0x138   : > { %v284_v5 = vpop.permute.xlu0 %283  ;;  %v308_v16 = vadd.f32 %v300_v10, %v278_v2 }
 0x139   : > { %v282_v4 = vpop.permute.xlu1 %281  ;;  %v303_v18 = vadd.f32 %v284_v5, %v263_v51 }
 0x13a   : > { %v302_v15 = vadd.f32 %v282_v4, %v262_v50 }
 0x13b   : > { %v311_v26 = vadd.f32 %v303_v18, %v284_v5 }
 0x13c   : > { %v288_v8 = vpop.permute.xlu0 %287  ;;  %v310_v24 = vadd.f32 %v302_v15, %v282_v4 }
 0x13d   : > { %v286_v7 = vpop.permute.xlu1 %285  ;;  %v305_v27 = vadd.f32 %v288_v8, %v265_v61 }
 0x13e   : > { %v304_v25 = vadd.f32 %v286_v7, %v264_v60 }
 0x13f   : > { %v313_v35 = vadd.f32 %v305_v27, %v288_v8 }
 0x140   : > { %v316_v13 = vpop.permute.xlu0 %315  ;;  %v312_v34 = vadd.f32 %v304_v25, %v286_v7 }
 0x141   : > { %v290_v12 = vpop.permute.xlu1 %289  ;;  %v339_v14 = vadd.f32 %v316_v13, %v307_v9 }
 0x142   : > { %v306_v36 = vadd.f32 %v290_v12, %v266_v0 }
 0x143   : > { %v347_v19 = vmul.f32 0.0625, %v339_v14 }
 0x144   : > { %v320_v21 = vpop.permute.xlu0 %319  ;;  %v314_v43 = vadd.f32 %v306_v36, %v290_v12 }
 0x145   : > { %v318_v20 = vpop.permute.xlu1 %317  ;;  %356 = vst.msk [vmem:[%s839_s30] sm:$0xff] %vm355_vm3, %v347_v19  ;;  %v341_v23 = vadd.f32 %v320_v21, %v309_v17 }
 0x146   : > { %v340_v22 = vadd.f32 %v318_v20, %v308_v16 }
 0x147   : > { %v349_v29 = vmul.f32 0.0625, %v341_v23 }
 0x148   : > { %v348_v28 = vmul.f32 0.0625, %v340_v22  ;;  %v324_v31 = vpop.permute.xlu0 %323 }
 0x149   : > { %v322_v30 = vpop.permute.xlu1 %321  ;;  %358 = vst.msk [vmem:[%s839_s30 + $0x10] sm:$0xff] %vm355_vm3, %v349_v29  ;;  %v343_v33 = vadd.f32 %v324_v31, %v311_v26 }
 0x14a   : > { %357 = vst.msk [vmem:[%s839_s30 + $0x8] sm:$0xff] %vm355_vm3, %v348_v28  ;;  %v342_v32 = vadd.f32 %v322_v30, %v310_v24 }
 0x14b   : > { %v351_v38 = vmul.f32 0.0625, %v343_v33 }
 0x14c   : > { %v350_v37 = vmul.f32 0.0625, %v342_v32  ;;  %v328_v40 = vpop.permute.xlu0 %327 }
 0x14d   : > { %v326_v39 = vpop.permute.xlu1 %325  ;;  %360 = vst.msk [vmem:[%s839_s30 + $0x20] sm:$0xff] %vm355_vm3, %v351_v38  ;;  %v345_v42 = vadd.f32 %v328_v40, %v313_v35 }
 0x14e   : > { %359 = vst.msk [vmem:[%s839_s30 + $0x18] sm:$0xff] %vm355_vm3, %v350_v37  ;;  %v344_v41 = vadd.f32 %v326_v39, %v312_v34 }
 0x14f   : > { %v353_v45 = vmul.f32 0.0625, %v345_v42 }
 0x150   : > { %v352_v44 = vmul.f32 0.0625, %v344_v41 }
 0x151   : > { %v330_v46 = vpop.permute.xlu1 %329  ;;  %362 = vst.msk [vmem:[%s839_s30 + $0x30] sm:$0xff] %vm355_vm3, %v353_v45 }
 0x152   : > { %361 = vst.msk [vmem:[%s839_s30 + $0x28] sm:$0xff] %vm355_vm3, %v352_v44  ;;  %v346_v47 = vadd.f32 %v330_v46, %v314_v43 }
 0x154   : > { %v354_v48 = vmul.f32 0.0625, %v346_v47 }
 0x156   : > { %363 = vst.msk [vmem:[%s839_s30 + $0x38] sm:$0xff] %vm355_vm3, %v354_v48 }
 0x157   : > { %598 = shalt.err (!%p595_p5)
}
 0x158   : > { %s599_s24 = scalar_lea.hbm %s860_s15, 1024  ;;  %s603_s3 = scalar_lea.hbm %s914_s1, 2048 }
 0x159   : > { %p600_p4 = scmp.ne.s32.totalorder %s860_s15, %s599_s24  ;;  %p604_p12 = scmp.lt.u32.totalorder %s860_s15, %s914_s1 }
 0x15a   : > { %p605_p1 = scmp.lt.u32.totalorder %s603_s3, %s599_s24  ;;  %p607_p8 = scmp.lt.u32.totalorder %s599_s24, %s860_s15 }
 0x15b   : > { %p601_p7 = pnand %p600_p4, %p922_p9 }
 0x15c   : > { %p606_p3 = por %p605_p1, %p604_p12 }
 0x15d   : > { %p602_p10 = pneg %p601_p7 }
 0x15e   : > { %p608_p11 = por %p607_p8, %p606_p3 }
 0x160   : > { %p609_p0 = pnand %p608_p11, %p602_p10 }
 0x162   : > { %612 = shalt.err (!%p609_p0)
}
 0x163   : > { %s677_s27 = smov 128   ;;  %s678_s29 = smov 8  }
 0x164   : > { %487 = dma.vmem_to_hbm [thread:$0]  (%p922_p9), %s862_s5, 1024, %s860_s15, %s365_s9, %s677_s27, %s677_s27, %s678_s29  }
 0x165 PF: > { %s396_s30 = sand.u32 1, %s647_s6   ;;  %p923_p6 = scmp.ne.s32.totalorder %s919_s21, 0 }
 0x166   : > { %p924_p13 = scmp.ge.s32.totalorder %s667_s11, 2  ;;  %s397_s2 = scalar_lea.sflag [#allocation5], %s396_s30 }
 0x168   : > { %p494_p2 = pnand %p924_p13, %p923_p6 }
 0x16a   : > { %642 = dma.done.wait (!%p494_p2), %s397_s2, 1024  }
 0x16b   : > { %644 = vsyncadd (!%p494_p2), %s397_s2, 4294966272  ;;  %s17_s11 = sadd.s32 1, %s667_s11   ;;  %s925_s6 = smov %s651_s7 }
 0x16c   : > { %p14_p5 = scmp.ge.s32.totalorder %s17_s11, 4   ;;  %s926_s7 = smov %s655_s8 }
 0x16d   : > { %s927_s8 = smov %s745_s20  ;;  %s928_s9 = smov %s663_s10 }
 0x16e   : > { %s929_s10 = smov %s931_s14  ;;  %16 = sbr.rel (!%p14_p5) target bundleno = 6 (0x6), region = 69 }
 0x175   :  { %402 = vsyncpa [#allocation4], 1 }
 0x176   :  { %404 = vsyncpa [#allocation4 + $0x1], 1 }
 0x177   :  { %405 = vsyncpa [#allocation5], 1 }
 0x178   :  { %407 = vsyncpa [#allocation5 + $0x1], 1 }

</bundles_post_ra>
